<compile_context>
chip_gen: v5e
topology: v5e:2x2
jax: 0.10.0
libtpu: 0.0.40
codegen_flags: <defaults>
</compile_context>

<pallas_src>
import functools

import jax
import jax.numpy as jnp
from jax.experimental import pallas as pl
from jax.experimental.pallas import tpu as pltpu


# ----------------------------------------------------------------------------
# Bilinear interpolation matrix (align_corners=True)
# ----------------------------------------------------------------------------
def _interp_matrix(out_size, in_size):
    """Row-stochastic bilinear interpolation matrix, align_corners=True."""
    if out_size == 1:
        src = jnp.zeros((1,), dtype=jnp.float32)
    else:
        src = jnp.arange(out_size, dtype=jnp.float32) * (
            (in_size - 1) / (out_size - 1)
        )
    i0 = jnp.clip(jnp.floor(src).astype(jnp.int32), 0, in_size - 1)
    i1 = jnp.clip(i0 + 1, 0, in_size - 1)
    w1 = src - i0.astype(jnp.float32)
    w0 = 1.0 - w1
    A = jnp.zeros((out_size, in_size), dtype=jnp.float32)
    rows = jnp.arange(out_size)
    A = A.at[rows, i0].add(w0)
    A = A.at[rows, i1].add(w1)
    return A


# ----------------------------------------------------------------------------
# Fused kernel: for every (salient, edge) pair do conv1x1+ReLU, resize, add.
# One grid step == one batch element; everything stays in VMEM/vregs.
# ----------------------------------------------------------------------------
def _ff_fused_kernel(*refs, n_sal, n_edge):
    S, E = n_sal, n_edge
    sal_refs = refs[:S]                                   # (Cin_i, Hin_i*Win_i)
    w_refs = refs[S:S + S * E]                            # (Cout_j, Cin_i)
    bt_refs = refs[S + S * E:S + 2 * S * E]               # (Hin_i*Win_i, Hout_j*Wout_j)
    edge_refs = refs[S + 2 * S * E:S + 2 * S * E + E]     # (Cout_j, Hout_j*Wout_j)
    out_refs = refs[S + 2 * S * E + E:]                   # (Cout_j, Hout_j*Wout_j)

    # Load each edge once; it is reused for every salient.
    edge_vals = [edge_refs[j][...] for j in range(E)]

    for i in range(S):
        s = sal_refs[i][...]                              # (Cin_i, HWin_i)
        for j in range(E):
            p = i * E + j
            w = w_refs[p][...]                            # (Cout_j, Cin_i)
            # 1x1 conv as channel matmul + ReLU (kept in f32 vregs).
            y = jnp.maximum(
                jnp.dot(w, s, preferred_element_type=jnp.float32), 0.0
            )                                             # (Cout_j, HWin_i)
            # Bilinear resize as a single lane-dense matmul with kron(Ah, Aw)^T.
            up = jnp.dot(
                y, bt_refs[p][...], preferred_element_type=jnp.float32
            )                                             # (Cout_j, HWout_j)
            out_refs[p][...] = up + edge_vals[j]


# ----------------------------------------------------------------------------
# FF forward (single fused pallas_call)
# ----------------------------------------------------------------------------
def ff_forward(features, weights, cfgs):
    """features: list of NCHW arrays ordered conv6..conv2 (as in the PyTorch module).
    weights[i][j]: (cfgs[0][j], cfgs[1][i]) float32, the 1x1 conv weight.
    Returns list of fused features in the same order as the PyTorch module."""
    feats = features[::-1]
    E = len(cfgs[0])
    edges = feats[:E]
    salients = feats[E:]
    S = len(salients)
    N = edges[0].shape[0]

    sal_shapes = [s.shape for s in salients]
    edge_shapes = [e.shape for e in edges]

    # Free (contiguous) reshapes: NCHW -> (N, C, H*W). No transposes.
    sal_flat = [s.reshape(s.shape[0], s.shape[1], s.shape[2] * s.shape[3])
                for s in salients]
    edge_flat = [e.reshape(e.shape[0], e.shape[1], e.shape[2] * e.shape[3])
                 for e in edges]

    # Precompute per-pair resize matrices Bt = kron(Ah, Aw)^T on the host.
    bts = []
    for i in range(S):
        _, _, hi, wi = sal_shapes[i]
        for j in range(E):
            _, _, ho, wo = edge_shapes[j]
            Ah = _interp_matrix(ho, hi)
            Aw = _interp_matrix(wo, wi)
            bts.append(jnp.transpose(jnp.kron(Ah, Aw)))   # (hi*wi, ho*wo)

    # Assemble inputs and BlockSpecs.
    inputs = []
    in_specs = []
    for i in range(S):
        _, ci, hi, wi = sal_shapes[i]
        inputs.append(sal_flat[i])
        in_specs.append(pl.BlockSpec((None, ci, hi * wi), lambda n: (n, 0, 0)))
    for i in range(S):
        for j in range(E):
            w = weights[i][j].astype(jnp.float32)
            inputs.append(w)
            in_specs.append(pl.BlockSpec(w.shape, lambda n: (0, 0)))
    for bt in bts:
        inputs.append(bt)
        in_specs.append(pl.BlockSpec(bt.shape, lambda n: (0, 0)))
    for j in range(E):
        _, co, ho, wo = edge_shapes[j]
        inputs.append(edge_flat[j])
        in_specs.append(pl.BlockSpec((None, co, ho * wo), lambda n: (n, 0, 0)))

    out_shapes = []
    out_specs = []
    for i in range(S):
        for j in range(E):
            _, co, ho, wo = edge_shapes[j]
            out_shapes.append(
                jax.ShapeDtypeStruct((N, co, ho * wo), jnp.float32))
            out_specs.append(
                pl.BlockSpec((None, co, ho * wo), lambda n: (n, 0, 0)))

    kernel = functools.partial(_ff_fused_kernel, n_sal=S, n_edge=E)

    outs_flat = pl.pallas_call(
        kernel,
        out_shape=tuple(out_shapes),
        grid=(N,),
        in_specs=in_specs,
        out_specs=tuple(out_specs),
        compiler_params=pltpu.CompilerParams(
            dimension_semantics=("parallel",)),
    )(*inputs)

    # Reshape back to NCHW (free, contiguous).
    outs = []
    k = 0
    for i in range(S):
        for j in range(E):
            _, co, ho, wo = edge_shapes[j]
            outs.append(outs_flat[k].reshape(N, co, ho, wo))
            k += 1
    return outs


# ----------------------------------------------------------------------------
# pure-JAX reference (for correctness check of the Pallas path)
# ----------------------------------------------------------------------------
def ff_reference(features, weights, cfgs):
    feats = features[::-1]
    edge_nums = len(cfgs[0])
    edges = feats[:edge_nums]
    salients = feats[edge_nums:]
    outs = []
    for i, salient in enumerate(salients):
        for j, edge in enumerate(edges):
            w = weights[i][j]
            y = jnp.maximum(jnp.einsum("nchw,oc->nohw", salient, w), 0.0)
            Hout, Wout = edge.shape[2], edge.shape[3]
            Ah = _interp_matrix(Hout, y.shape[2])
            Aw = _interp_matrix(Wout, y.shape[3])
            up = jnp.einsum("Hh,nchw,Ww->ncHW", Ah, y, Aw)
            outs.append(up + edge)
    return outs


if __name__ == "__main__":
    # cfgs[0] = edge channel counts, cfgs[1] = salient channel counts
    cfgs = ([8, 16], [32, 64])
    N = 2

    key = jax.random.PRNGKey(0)
    k = jax.random.split(key, 16)

    # edge features (large spatial), salient features (small spatial), all NCHW
    edge0 = jax.random.normal(k[0], (N, 8, 16, 16), dtype=jnp.float32)
    edge1 = jax.random.normal(k[1], (N, 16, 8, 8), dtype=jnp.float32)
    sal0 = jax.random.normal(k[2], (N, 32, 4, 4), dtype=jnp.float32)
    sal1 = jax.random.normal(k[3], (N, 64, 4, 4), dtype=jnp.float32)

    # module consumes features ordered conv6..conv2; after features[::-1] we need
    # [edge0, edge1, sal0, sal1], so pass the reverse of that:
    features = [sal1, sal0, edge1, edge0]

    # deterministic 1x1-conv weights: weights[i][j] has shape (cfgs[0][j], cfgs[1][i])
    weights = []
    kidx = 4
    for i, c_sal in enumerate(cfgs[1]):
        row = []
        for j, c_edge in enumerate(cfgs[0]):
            w = jax.random.normal(k[kidx], (c_edge, c_sal), dtype=jnp.float32) * 0.1
            kidx += 1
            row.append(w)
        weights.append(row)

    outs = ff_forward(features, weights, cfgs)
    outs = [jax.block_until_ready(o) for o in outs]

    refs = ff_reference(features, weights, cfgs)
    for o, r in zip(outs, refs):
        assert o.shape == r.shape, (o.shape, r.shape)
        assert jnp.allclose(o, r, rtol=1e-3, atol=1e-3), float(
            jnp.max(jnp.abs(o - r))
        )

    print("KERNEL_OK")
</pallas_src>

<mosaic_0001>
module attributes {stable_mosaic.version = 11 : i64} {
  func.func @_ff_fused_kernel(%arg0: i32, %arg1: memref<1x32x16xf32, #tpu.memory_space<vmem>>, %arg2: memref<1x64x16xf32, #tpu.memory_space<vmem>>, %arg3: memref<8x32xf32, #tpu.memory_space<vmem>>, %arg4: memref<16x32xf32, #tpu.memory_space<vmem>>, %arg5: memref<8x64xf32, #tpu.memory_space<vmem>>, %arg6: memref<16x64xf32, #tpu.memory_space<vmem>>, %arg7: memref<16x256xf32, #tpu.memory_space<vmem>>, %arg8: memref<16x64xf32, #tpu.memory_space<vmem>>, %arg9: memref<16x256xf32, #tpu.memory_space<vmem>>, %arg10: memref<16x64xf32, #tpu.memory_space<vmem>>, %arg11: memref<1x8x256xf32, #tpu.memory_space<vmem>>, %arg12: memref<1x16x64xf32, #tpu.memory_space<vmem>>, %arg13: memref<1x8x256xf32, #tpu.memory_space<vmem>>, %arg14: memref<1x16x64xf32, #tpu.memory_space<vmem>>, %arg15: memref<1x8x256xf32, #tpu.memory_space<vmem>>, %arg16: memref<1x16x64xf32, #tpu.memory_space<vmem>>) attributes {dimension_semantics = [#tpu.dimension_semantics<parallel>], iteration_bounds = array<i64: 2>, scalar_prefetch = 0 : i64, scratch_operands = 0 : i64, tpu.core_type = #tpu.core_type<tc>, window_params = [{transform_indices = @transform_0, window_bounds = array<i64: 1, 32, 16>}, {transform_indices = @transform_1, window_bounds = array<i64: 1, 64, 16>}, {pipeline_mode = #tpu.pipeline_mode<synchronous>, transform_indices = @transform_2, window_bounds = array<i64: 8, 32>}, {pipeline_mode = #tpu.pipeline_mode<synchronous>, transform_indices = @transform_3, window_bounds = array<i64: 16, 32>}, {pipeline_mode = #tpu.pipeline_mode<synchronous>, transform_indices = @transform_4, window_bounds = array<i64: 8, 64>}, {pipeline_mode = #tpu.pipeline_mode<synchronous>, transform_indices = @transform_5, window_bounds = array<i64: 16, 64>}, {pipeline_mode = #tpu.pipeline_mode<synchronous>, transform_indices = @transform_6, window_bounds = array<i64: 16, 256>}, {pipeline_mode = #tpu.pipeline_mode<synchronous>, transform_indices = @transform_7, window_bounds = array<i64: 16, 64>}, {pipeline_mode = #tpu.pipeline_mode<synchronous>, transform_indices = @transform_8, window_bounds = array<i64: 16, 256>}, {pipeline_mode = #tpu.pipeline_mode<synchronous>, transform_indices = @transform_9, window_bounds = array<i64: 16, 64>}, {transform_indices = @transform_10, window_bounds = array<i64: 1, 8, 256>}, {transform_indices = @transform_11, window_bounds = array<i64: 1, 16, 64>}, {transform_indices = @transform_12, window_bounds = array<i64: 1, 8, 256>}, {transform_indices = @transform_13, window_bounds = array<i64: 1, 16, 64>}, {transform_indices = @transform_14, window_bounds = array<i64: 1, 8, 256>}, {transform_indices = @transform_15, window_bounds = array<i64: 1, 16, 64>}]} {
    %c0 = arith.constant 0 : index
    %c0_0 = arith.constant 0 : index
    %c0_1 = arith.constant 0 : index
    %0 = vector.load %arg11[%c0, %c0_0, %c0_1] : memref<1x8x256xf32, #tpu.memory_space<vmem>>, vector<1x8x256xf32>
    %1 = vector.shape_cast %0 : vector<1x8x256xf32> to vector<8x256xf32>
    %c0_2 = arith.constant 0 : index
    %c0_3 = arith.constant 0 : index
    %c0_4 = arith.constant 0 : index
    %2 = vector.load %arg12[%c0_2, %c0_3, %c0_4] : memref<1x16x64xf32, #tpu.memory_space<vmem>>, vector<1x16x64xf32>
    %3 = vector.shape_cast %2 : vector<1x16x64xf32> to vector<16x64xf32>
    %c0_5 = arith.constant 0 : index
    %c0_6 = arith.constant 0 : index
    %c0_7 = arith.constant 0 : index
    %4 = vector.load %arg1[%c0_5, %c0_6, %c0_7] : memref<1x32x16xf32, #tpu.memory_space<vmem>>, vector<1x32x16xf32>
    %5 = vector.shape_cast %4 : vector<1x32x16xf32> to vector<32x16xf32>
    %c0_8 = arith.constant 0 : index
    %c0_9 = arith.constant 0 : index
    %6 = vector.load %arg3[%c0_8, %c0_9] : memref<8x32xf32, #tpu.memory_space<vmem>>, vector<8x32xf32>
    %cst = arith.constant dense<0.000000e+00> : vector<8x16xf32>
    %7 = tpu.matmul %6, %5, %cst {dimension_numbers = #tpu.dot_dimension_numbers<[1], [0], [0], [1], [0, 0, 1, 1], [], []>} : vector<8x32xf32>, vector<32x16xf32>, vector<8x16xf32> -> vector<8x16xf32>
    %cst_10 = arith.constant 0.000000e+00 : f32
    %8 = vector.broadcast %cst_10 : f32 to vector<8x16xf32>
    %9 = arith.maximumf %7, %8 : vector<8x16xf32>
    %c0_11 = arith.constant 0 : index
    %c0_12 = arith.constant 0 : index
    %10 = vector.load %arg7[%c0_11, %c0_12] : memref<16x256xf32, #tpu.memory_space<vmem>>, vector<16x256xf32>
    %cst_13 = arith.constant dense<0.000000e+00> : vector<8x256xf32>
    %11 = tpu.matmul %9, %10, %cst_13 {dimension_numbers = #tpu.dot_dimension_numbers<[1], [0], [0], [1], [0, 0, 1, 1], [], []>} : vector<8x16xf32>, vector<16x256xf32>, vector<8x256xf32> -> vector<8x256xf32>
    %12 = arith.addf %11, %1 : vector<8x256xf32>
    %c0_14 = arith.constant 0 : index
    %c0_15 = arith.constant 0 : index
    %c0_16 = arith.constant 0 : index
    %13 = vector.load %arg13[%c0_14, %c0_15, %c0_16] : memref<1x8x256xf32, #tpu.memory_space<vmem>>, vector<1x8x256xf32>
    %14 = vector.shape_cast %13 : vector<1x8x256xf32> to vector<8x256xf32>
    %15 = vector.shape_cast %12 : vector<8x256xf32> to vector<1x8x256xf32>
    tpu.vector_store %arg13[%c0_14, %c0_15, %c0_16], %15 {strides = array<i32>} : memref<1x8x256xf32, #tpu.memory_space<vmem>>, vector<1x8x256xf32>,
    %c0_17 = arith.constant 0 : index
    %c0_18 = arith.constant 0 : index
    %16 = vector.load %arg4[%c0_17, %c0_18] : memref<16x32xf32, #tpu.memory_space<vmem>>, vector<16x32xf32>
    %cst_19 = arith.constant dense<0.000000e+00> : vector<16x16xf32>
    %17 = tpu.matmul %16, %5, %cst_19 {dimension_numbers = #tpu.dot_dimension_numbers<[1], [0], [0], [1], [0, 0, 1, 1], [], []>} : vector<16x32xf32>, vector<32x16xf32>, vector<16x16xf32> -> vector<16x16xf32>
    %cst_20 = arith.constant 0.000000e+00 : f32
    %18 = vector.broadcast %cst_20 : f32 to vector<16x16xf32>
    %19 = arith.maximumf %17, %18 : vector<16x16xf32>
    %c0_21 = arith.constant 0 : index
    %c0_22 = arith.constant 0 : index
    %20 = vector.load %arg8[%c0_21, %c0_22] : memref<16x64xf32, #tpu.memory_space<vmem>>, vector<16x64xf32>
    %cst_23 = arith.constant dense<0.000000e+00> : vector<16x64xf32>
    %21 = tpu.matmul %19, %20, %cst_23 {dimension_numbers = #tpu.dot_dimension_numbers<[1], [0], [0], [1], [0, 0, 1, 1], [], []>} : vector<16x16xf32>, vector<16x64xf32>, vector<16x64xf32> -> vector<16x64xf32>
    %22 = arith.addf %21, %3 : vector<16x64xf32>
    %c0_24 = arith.constant 0 : index
    %c0_25 = arith.constant 0 : index
    %c0_26 = arith.constant 0 : index
    %23 = vector.load %arg14[%c0_24, %c0_25, %c0_26] : memref<1x16x64xf32, #tpu.memory_space<vmem>>, vector<1x16x64xf32>
    %24 = vector.shape_cast %23 : vector<1x16x64xf32> to vector<16x64xf32>
    %25 = vector.shape_cast %22 : vector<16x64xf32> to vector<1x16x64xf32>
    tpu.vector_store %arg14[%c0_24, %c0_25, %c0_26], %25 {strides = array<i32>} : memref<1x16x64xf32, #tpu.memory_space<vmem>>, vector<1x16x64xf32>,
    %c0_27 = arith.constant 0 : index
    %c0_28 = arith.constant 0 : index
    %c0_29 = arith.constant 0 : index
    %26 = vector.load %arg2[%c0_27, %c0_28, %c0_29] : memref<1x64x16xf32, #tpu.memory_space<vmem>>, vector<1x64x16xf32>
    %27 = vector.shape_cast %26 : vector<1x64x16xf32> to vector<64x16xf32>
    %c0_30 = arith.constant 0 : index
    %c0_31 = arith.constant 0 : index
    %28 = vector.load %arg5[%c0_30, %c0_31] : memref<8x64xf32, #tpu.memory_space<vmem>>, vector<8x64xf32>
    %cst_32 = arith.constant dense<0.000000e+00> : vector<8x16xf32>
    %29 = tpu.matmul %28, %27, %cst_32 {dimension_numbers = #tpu.dot_dimension_numbers<[1], [0], [0], [1], [0, 0, 1, 1], [], []>} : vector<8x64xf32>, vector<64x16xf32>, vector<8x16xf32> -> vector<8x16xf32>
    %cst_33 = arith.constant 0.000000e+00 : f32
    %30 = vector.broadcast %cst_33 : f32 to vector<8x16xf32>
    %31 = arith.maximumf %29, %30 : vector<8x16xf32>
    %c0_34 = arith.constant 0 : index
    %c0_35 = arith.constant 0 : index
    %32 = vector.load %arg9[%c0_34, %c0_35] : memref<16x256xf32, #tpu.memory_space<vmem>>, vector<16x256xf32>
    %cst_36 = arith.constant dense<0.000000e+00> : vector<8x256xf32>
    %33 = tpu.matmul %31, %32, %cst_36 {dimension_numbers = #tpu.dot_dimension_numbers<[1], [0], [0], [1], [0, 0, 1, 1], [], []>} : vector<8x16xf32>, vector<16x256xf32>, vector<8x256xf32> -> vector<8x256xf32>
    %34 = arith.addf %33, %1 : vector<8x256xf32>
    %c0_37 = arith.constant 0 : index
    %c0_38 = arith.constant 0 : index
    %c0_39 = arith.constant 0 : index
    %35 = vector.load %arg15[%c0_37, %c0_38, %c0_39] : memref<1x8x256xf32, #tpu.memory_space<vmem>>, vector<1x8x256xf32>
    %36 = vector.shape_cast %35 : vector<1x8x256xf32> to vector<8x256xf32>
    %37 = vector.shape_cast %34 : vector<8x256xf32> to vector<1x8x256xf32>
    tpu.vector_store %arg15[%c0_37, %c0_38, %c0_39], %37 {strides = array<i32>} : memref<1x8x256xf32, #tpu.memory_space<vmem>>, vector<1x8x256xf32>,
    %c0_40 = arith.constant 0 : index
    %c0_41 = arith.constant 0 : index
    %38 = vector.load %arg6[%c0_40, %c0_41] : memref<16x64xf32, #tpu.memory_space<vmem>>, vector<16x64xf32>
    %cst_42 = arith.constant dense<0.000000e+00> : vector<16x16xf32>
    %39 = tpu.matmul %38, %27, %cst_42 {dimension_numbers = #tpu.dot_dimension_numbers<[1], [0], [0], [1], [0, 0, 1, 1], [], []>} : vector<16x64xf32>, vector<64x16xf32>, vector<16x16xf32> -> vector<16x16xf32>
    %cst_43 = arith.constant 0.000000e+00 : f32
    %40 = vector.broadcast %cst_43 : f32 to vector<16x16xf32>
    %41 = arith.maximumf %39, %40 : vector<16x16xf32>
    %c0_44 = arith.constant 0 : index
    %c0_45 = arith.constant 0 : index
    %42 = vector.load %arg10[%c0_44, %c0_45] : memref<16x64xf32, #tpu.memory_space<vmem>>, vector<16x64xf32>
    %cst_46 = arith.constant dense<0.000000e+00> : vector<16x64xf32>
    %43 = tpu.matmul %41, %42, %cst_46 {dimension_numbers = #tpu.dot_dimension_numbers<[1], [0], [0], [1], [0, 0, 1, 1], [], []>} : vector<16x16xf32>, vector<16x64xf32>, vector<16x64xf32> -> vector<16x64xf32>
    %44 = arith.addf %43, %3 : vector<16x64xf32>
    %c0_47 = arith.constant 0 : index
    %c0_48 = arith.constant 0 : index
    %c0_49 = arith.constant 0 : index
    %45 = vector.load %arg16[%c0_47, %c0_48, %c0_49] : memref<1x16x64xf32, #tpu.memory_space<vmem>>, vector<1x16x64xf32>
    %46 = vector.shape_cast %45 : vector<1x16x64xf32> to vector<16x64xf32>
    %47 = vector.shape_cast %44 : vector<16x64xf32> to vector<1x16x64xf32>
    tpu.vector_store %arg16[%c0_47, %c0_48, %c0_49], %47 {strides = array<i32>} : memref<1x16x64xf32, #tpu.memory_space<vmem>>, vector<1x16x64xf32>,
    return
  }
  func.func @transform_0(%arg0: i32) -> (i32, i32, i32) {
    %c0_i32 = arith.constant 0 : i32
    %c0_i32_0 = arith.constant 0 : i32
    %c0_i32_1 = arith.constant 0 : i32
    return %arg0, %c0_i32, %c0_i32_0 : i32, i32, i32
  }
  func.func @transform_1(%arg0: i32) -> (i32, i32, i32) {
    %c0_i32 = arith.constant 0 : i32
    %c0_i32_0 = arith.constant 0 : i32
    %c0_i32_1 = arith.constant 0 : i32
    return %arg0, %c0_i32, %c0_i32_0 : i32, i32, i32
  }
  func.func @transform_2(%arg0: i32) -> (i32, i32) {
    %c0_i32 = arith.constant 0 : i32
    %c0_i32_0 = arith.constant 0 : i32
    %c0_i32_1 = arith.constant 0 : i32
    return %c0_i32, %c0_i32_0 : i32, i32
  }
  func.func @transform_3(%arg0: i32) -> (i32, i32) {
    %c0_i32 = arith.constant 0 : i32
    %c0_i32_0 = arith.constant 0 : i32
    %c0_i32_1 = arith.constant 0 : i32
    return %c0_i32, %c0_i32_0 : i32, i32
  }
  func.func @transform_4(%arg0: i32) -> (i32, i32) {
    %c0_i32 = arith.constant 0 : i32
    %c0_i32_0 = arith.constant 0 : i32
    %c0_i32_1 = arith.constant 0 : i32
    return %c0_i32, %c0_i32_0 : i32, i32
  }
  func.func @transform_5(%arg0: i32) -> (i32, i32) {
    %c0_i32 = arith.constant 0 : i32
    %c0_i32_0 = arith.constant 0 : i32
    %c0_i32_1 = arith.constant 0 : i32
    return %c0_i32, %c0_i32_0 : i32, i32
  }
  func.func @transform_6(%arg0: i32) -> (i32, i32) {
    %c0_i32 = arith.constant 0 : i32
    %c0_i32_0 = arith.constant 0 : i32
    %c0_i32_1 = arith.constant 0 : i32
    return %c0_i32, %c0_i32_0 : i32, i32
  }
  func.func @transform_7(%arg0: i32) -> (i32, i32) {
    %c0_i32 = arith.constant 0 : i32
    %c0_i32_0 = arith.constant 0 : i32
    %c0_i32_1 = arith.constant 0 : i32
    return %c0_i32, %c0_i32_0 : i32, i32
  }
  func.func @transform_8(%arg0: i32) -> (i32, i32) {
    %c0_i32 = arith.constant 0 : i32
    %c0_i32_0 = arith.constant 0 : i32
    %c0_i32_1 = arith.constant 0 : i32
    return %c0_i32, %c0_i32_0 : i32, i32
  }
  func.func @transform_9(%arg0: i32) -> (i32, i32) {
    %c0_i32 = arith.constant 0 : i32
    %c0_i32_0 = arith.constant 0 : i32
    %c0_i32_1 = arith.constant 0 : i32
    return %c0_i32, %c0_i32_0 : i32, i32
  }
  func.func @transform_10(%arg0: i32) -> (i32, i32, i32) {
    %c0_i32 = arith.constant 0 : i32
    %c0_i32_0 = arith.constant 0 : i32
    %c0_i32_1 = arith.constant 0 : i32
    return %arg0, %c0_i32, %c0_i32_0 : i32, i32, i32
  }
  func.func @transform_11(%arg0: i32) -> (i32, i32, i32) {
    %c0_i32 = arith.constant 0 : i32
    %c0_i32_0 = arith.constant 0 : i32
    %c0_i32_1 = arith.constant 0 : i32
    return %arg0, %c0_i32, %c0_i32_0 : i32, i32, i32
  }
  func.func @transform_12(%arg0: i32) -> (i32, i32, i32) {
    %c0_i32 = arith.constant 0 : i32
    %c0_i32_0 = arith.constant 0 : i32
    %c0_i32_1 = arith.constant 0 : i32
    return %arg0, %c0_i32, %c0_i32_0 : i32, i32, i32
  }
  func.func @transform_13(%arg0: i32) -> (i32, i32, i32) {
    %c0_i32 = arith.constant 0 : i32
    %c0_i32_0 = arith.constant 0 : i32
    %c0_i32_1 = arith.constant 0 : i32
    return %arg0, %c0_i32, %c0_i32_0 : i32, i32, i32
  }
  func.func @transform_14(%arg0: i32) -> (i32, i32, i32) {
    %c0_i32 = arith.constant 0 : i32
    %c0_i32_0 = arith.constant 0 : i32
    %c0_i32_1 = arith.constant 0 : i32
    return %arg0, %c0_i32, %c0_i32_0 : i32, i32, i32
  }
  func.func @transform_15(%arg0: i32) -> (i32, i32, i32) {
    %c0_i32 = arith.constant 0 : i32
    %c0_i32_0 = arith.constant 0 : i32
    %c0_i32_1 = arith.constant 0 : i32
    return %arg0, %c0_i32, %c0_i32_0 : i32, i32, i32
  }
}

</mosaic_0001>

<bundles_post_ra>
// kernel: tpu_custom_call.1
= control target key start
LH: loop header
LB: loop body
LE: loop exit
PB: predicated region body
PF: predicated region fallthrough
CT: control target
= control target key end

     0   :  { %s1752_s0 = inlined_call_operand.vmem [shape: f32[2,32,16], index: 0, kind: input, shape index: {}]   ;;  %s1753_s1 = inlined_call_operand.vmem [shape: f32[2,64,16], index: 1, kind: input, shape index: {}]   ;;  %s1754_s2 = inlined_call_operand.vmem [shape: f32[8,32], index: 2, kind: input, shape index: {}]   ;;  %s1755_s3 = inlined_call_operand.vmem [shape: f32[16,32], index: 3, kind: input, shape index: {}]   ;;  %s1756_s4 = inlined_call_operand.vmem [shape: f32[8,64], index: 4, kind: input, shape index: {}]   ;;  %s1757_s5 = inlined_call_operand.vmem [shape: f32[16,64], index: 5, kind: input, shape index: {}]   ;;  %s1758_s6 = inlined_call_operand.vmem [shape: f32[16,256], index: 6, kind: input, shape index: {}]   ;;  %s1759_s7 = inlined_call_operand.vmem [shape: f32[16,64], index: 7, kind: input, shape index: {}]   ;;  %s1760_s8 = inlined_call_operand.vmem [shape: f32[16,256], index: 8, kind: input, shape index: {}]   ;;  %s1761_s9 = inlined_call_operand.vmem [shape: f32[16,64], index: 9, kind: input, shape index: {}]   ;;  %s1762_s10 = inlined_call_operand.vmem [shape: f32[2,8,256], index: 10, kind: input, shape index: {}]   ;;  %s1763_s11 = inlined_call_operand.vmem [shape: f32[2,16,64], index: 11, kind: input, shape index: {}]   ;;  %s1764_s12 = inlined_call_operand.hbm [shape: f32[2,8,256], index: 12, kind: output, shape index: {0}]   ;;  %s1765_s13 = inlined_call_operand.hbm [shape: f32[2,16,64], index: 13, kind: output, shape index: {1}]   ;;  %s1766_s14 = inlined_call_operand.hbm [shape: f32[2,8,256], index: 14, kind: output, shape index: {2}]   ;;  %s1767_s15 = inlined_call_operand.hbm [shape: f32[2,16,64], index: 15, kind: output, shape index: {3}]  }
   0x1   :  { %1775 = sst [smem:[#allocation17_spill]] %s1752_s0 }
   0x2   :  { %1776 = sst [smem:[#allocation18_spill]] %s1753_s1 }
   0x3   :  { %1777 = sst [smem:[#allocation19_spill]] %s1754_s2 }
   0x4   :  { %1778 = sst [smem:[#allocation20_spill]] %s1755_s3 }
   0x5   :  { %1779 = sst [smem:[#allocation21_spill]] %s1756_s4 }
   0x6   :  { %1780 = sst [smem:[#allocation22_spill]] %s1757_s5 }
   0x7   :  { %1781 = sst [smem:[#allocation23_spill]] %s1758_s6 }
   0x8   :  { %21 = vsyncpa [#allocation3], 0 }
   0x9   :  { %23 = vsyncpa [#allocation3 + $0x1], 0 }
   0xa   :  { %24 = vsyncpa [#allocation5], 0 }
   0xb   :  { %26 = vsyncpa [#allocation5 + $0x1], 0 }
   0xc   :  { %27 = vsyncpa [#allocation8], 0 }
   0xd   :  { %29 = vsyncpa [#allocation8 + $0x1], 0  ;;  %s1498_s18 = smov 0   ;;  %s1500_s19 = smov 0  }
   0xe   :  { %s1502_s20 = smov 0   ;;  %s1504_s21 = smov 0  }
   0xf LB: > { %1782 = sst [smem:[#allocation12_spill]] %s1402_s18  ;;  %s1519_s22 = sadd.s32 4294967295, %s1414_s21   ;;  %s1414_s21 = sphi %s1504_s21, %s1800_s21   ;;  %s1410_s20 = sphi %s1502_s20, %s1802_s20   ;;  %s1406_s19 = sphi %s1500_s19, %s1804_s19   ;;  %s1402_s18 = sphi %s1498_s18, %s1803_s18  }
  0x10   : > { %1783 = sst [smem:[#allocation13_spill]] %s1410_s20  ;;  %s1768_s23 = sadd.s32 4294967294, %s1414_s21  }
  0x11   : > { %s1523_s24 = sadd.s32 1, %s1414_s21   ;;  %s314_s25 = sadd.s32 1, %s1410_s20 }
  0x12   : > { %1784 = sst [smem:[#allocation14_spill]] %s1523_s24  ;;  %s311_s26 = ssub.s32 %s1414_s21, %s1523_s24 }
  0x13   : > { %p324_p0 = scmp.ne.s32.totalorder %s1410_s20, %s1406_s19  ;;  %p312_p1 = scmp.eq.s32.totalorder %s311_s26, 0 }
  0x14   : > { %p325_p2 = scmp.eq.s32.totalorder %s1519_s22, 1  ;;  %p330_p3 = scmp.ne.s32.totalorder %s1406_s19, %s1402_s18 }
  0x15   : > { %p331_p4 = scmp.eq.s32.totalorder %s1768_s23, 1  ;;  %p1155_p7 = scmp.ge.s32.totalorder %s1414_s21, 1 }
  0x16   : > { %s1536_s27 = scalar_select %p312_p1, %s1410_s20, %s314_s25  }
  0x17   : > { %p1538_p5 = por %p325_p2, %p324_p0  ;;  %p1542_p6 = por %p331_p4, %p330_p3 }
  0x18   : > { %1785 = sst [smem:[#allocation15_spill]] %s1536_s27  ;;  %p483_p8 = scmp.lt.s32.totalorder %s1414_s21, 3 }
  0x19   : > { %s1787_s29 = scalar_select %p1542_p6, 1, 0 }
  0x1a   : > { %p484_p9 = pnand %p1155_p7, %p483_p8 }
  0x1b   : > { %1788 = sst [smem:[#allocation16_spill]] %s1787_s29  ;;  %p561_p10 = scmp.lt.s32.totalorder (!%p484_p9), %s1519_s22, 1 }
  0x1c   : > { %487 = sbr.rel (%p484_p9) target bundleno = 462 (0x1ce), region = 68  ;;  %s1789_s6 = sld [smem:[#allocation23_spill]] (!%p484_p9) }
  0x1d   : > { %s1790_s0 = sld [smem:[#allocation17_spill]] (!%p484_p9)  ;;  %s1627_s20 = sand.u32 (!%p484_p9), 1, %s1406_s19  }
  0x1e   : > { %s1791_s2 = sld [smem:[#allocation19_spill]] (!%p484_p9)  ;;  %s1636_s29 = sshll.u32 (!%p484_p9), %s1627_s20, 4 }
  0x1f   : > { %s1792_s1 = sld [smem:[#allocation18_spill]] (!%p484_p9)  ;;  %s881_s18 = scalar_lea.sflag (!%p484_p9), [#allocation3], %s1627_s20 }
  0x20   : > { %s1793_s3 = sld [smem:[#allocation20_spill]] (!%p484_p9) }
  0x21   : > { %s1553_s17 = scalar_select %p561_p10, %s1519_s22, 1  ;;  %vm590_vm0 = vcmask 261120   ;;  %vm729_vm1 = vcmask 523264   ;;  %vm619_vm2 = vcmask 130048   ;;  %v699_v24 = vld [vmem:[%s1759_s7 + $0x8] sm:$0xff]  ;;  %v698_v27 = vld [vmem:[%s1759_s7] sm:$0xff] }
  0x22   : > { %v617_v0 = vld [vmem:[%s1789_s6 + $0x10] sm:$0xff]  ;;  %v615_v6 = vld [vmem:[%s1789_s6] sm:$0xff]  ;;  %v618_v7 = vld [vmem:[%s1789_s6 + $0x18] sm:$0xff]  ;;  %s1794_s5 = sld [smem:[#allocation22_spill]]  ;;  %720 = vmatpush.msra.mxu1 %v699_v24 }
  0x23   : > { %637 = vmatpush.msra.mxu2 %v617_v0  ;;  %s1196_s25 = sshll.u32 %s1553_s17, 5  ;;  %s1197_s23 = sshll.u32 %s1553_s17, 6  ;;  %v616_v8 = vld [vmem:[%s1789_s6 + $0x8] sm:$0xff]  ;;  %v767_v31 = vld [vmem:[%s1760_s8 + $0x10] sm:$0xff]  ;;  %v847_v32 = vld [vmem:[%s1761_s9] sm:$0xff] }
  0x24   : > { %s565_s27 = scalar_lea.vmem %s1790_s0, %s1196_s25  ;;  %v589_v5 = vld [vmem:[%s1791_s2] sm:$0xff]  ;;  %s1795_s4 = sld [smem:[#allocation21_spill]]  ;;  %721 = vmatpush.msra.mxu1 %v698_v27  ;;  %v848_v28 = vld [vmem:[%s1761_s9 + $0x8] sm:$0xff]  ;;  %v768_v36 = vld [vmem:[%s1760_s8 + $0x18] sm:$0xff] }
  0x25   : > { %v588_v1 = vld [vmem:[%s565_s27 + $0x18] sm:$0xff]  ;;  %v587_v2 = vld [vmem:[%s565_s27 + $0x10] sm:$0xff]  ;;  %v586_v3 = vld [vmem:[%s565_s27 + $0x8] sm:$0xff]  ;;  %638 = vmatpush.msra.mxu2 %v615_v6  ;;  %s1774_s0 = sshll.u32 %s1553_s17, 4  ;;  %s1647_s25 = sshll.u32 %s1519_s22, 4 }
  0x26   : > { %606 = vmatpush.msra.mxu0 %v588_v1  ;;  %685 = vmatpush.msra.mxu3 %v588_v1  ;;  %v585_v4 = vld [vmem:[%s565_s27] sm:$0xff]  ;;  %s570_s27 = scalar_lea.vmem %s1792_s1, %s1197_s23  ;;  %v666_v14 = vld [vmem:[%s1793_s3 + $0x8] sm:$0xff]  ;;  %s575_s24 = scalar_lea.vmem %s1762_s10, %s1774_s0 }
  0x27   : > { %657 = vmatpush.msrb.mxu2 %v618_v7  ;;  %v665_v9 = vld [vmem:[%s1793_s3] sm:$0xff]  ;;  %v739_v10 = vld [vmem:[%s570_s27 + $0x38] sm:$0xff]  ;;  %v738_v11 = vld [vmem:[%s570_s27 + $0x30] sm:$0xff]  ;;  %869 = vmatpush.msrb.mxu1 %v848_v28  ;;  %s539_s23 = scalar_lea.vmem [#allocation2], %s1636_s29  ;;  %s907_s30 = scalar_lea.hbm %s1764_s12, %s1647_s25 }
  0x28   : > { %607 = vmatpush.msra.mxu0 %v587_v2  ;;  %686 = vmatpush.msra.mxu3 %v587_v2  ;;  %v737_v12 = vld [vmem:[%s570_s27 + $0x28] sm:$0xff]  ;;  %v736_v13 = vld [vmem:[%s570_s27 + $0x20] sm:$0xff]  ;;  %v735_v15 = vld [vmem:[%s570_s27 + $0x18] sm:$0xff]  ;;  %s909_s16 = sshll.u32 %s539_s23, 4  ;;  %s911_s2 = sshll.u32 %s907_s30, 4  ;;  %s910_s16 = int_to_ptr.vmem [resolvable:$true] %s909_s16  ;;  %s912_s2 = int_to_ptr.hbm [resolvable:$true] %s911_s2 }
  0x29   : > { %658 = vmatpush.msrb.mxu2 %v616_v8  ;;  %v734_v16 = vld [vmem:[%s570_s27 + $0x10] sm:$0xff]  ;;  %v733_v17 = vld [vmem:[%s570_s27 + $0x8] sm:$0xff]  ;;  %v732_v18 = vld [vmem:[%s570_s27] sm:$0xff]  ;;  %870 = vmatpush.msrb.mxu1 %v847_v32 }
  0x2a   : > { %608 = vmatpush.msra.mxu0 %v586_v3  ;;  %687 = vmatpush.msra.mxu3 %v586_v3  ;;  %v814_v19 = vld [vmem:[%s1794_s5] sm:$0xff]  ;;  %v815_v20 = vld [vmem:[%s1794_s5 + $0x8] sm:$0xff] }
  0x2b   : > { %v740_v23 = vld [vmem:[%s1795_s4] sm:$0xff]  ;;  %v766_v37 = vld [vmem:[%s1760_s8 + $0x8] sm:$0xff]  ;;  %s1280_s4 = scalar_lea.hbm %s1764_s12, 32 }
  0x2c   : > { %609 = vmatpush.msra.mxu0 %v585_v4  ;;  %688 = vmatpush.msra.mxu3 %v585_v4  ;;  %v765_v33 = vld [vmem:[%s1760_s8] sm:$0xff]  ;;  %v1642_v43 = vld [vmem:[%s575_s24 + $0x8] sm:$0xff] }
  0x2d   : > { %1168 = vmatmul.msk.f32.vlgmr.msra.gmra.mxu0 %vm590_vm0, %v589_v5  ;;  %1171 = vmatmul.msk.f32.vlgmr.msra.gmra.mxu3 %vm590_vm0, %v665_v9  ;;  %v1638_v40 = vld [vmem:[%s575_s24] sm:$0xff]  ;;  %s1274_s24 = sshra.s32 %s912_s2, 4  ;;  %s1275_s24 = int_to_ptr.hbm [resolvable:$true] %s1274_s24 }
  0x2e   : > { %830 = vmatpush.msrb.mxu3 %v739_v10  ;;  %786 = vmatpush.msrb.mxu0 %v767_v31  ;;  %s1276_s0 = scalar_lea.hbm %s1275_s24, 16  ;;  %p1281_p0 = scmp.lt.s32.totalorder %s1275_s24, %s1764_s12 }
  0x2f   : > { %p1277_p11 = scmp.ne.s32.totalorder %s1275_s24, %s1276_s0  ;;  %p1282_p1 = scmp.lt.s32.totalorder %s1280_s4, %s1276_s0 }
  0x30   : > { %831 = vmatpush.msrb.mxu3 %v738_v11  ;;  %787 = vmatpush.msrb.mxu0 %v765_v33 }
  0x31   : > { %p1278_p12 = pnand %p1277_p11, %p1538_p5  ;;  %p1283_p2 = por %p1282_p1, %p1281_p0 }
  0x32   : > { %832 = vmatpush.msrb.mxu3 %v737_v12  ;;  %806 = vmatpush.msra.mxu0 %v768_v36 }
  0x33   : > { %p1279_p13 = pneg %p1278_p12 }
  0x34   : > { %833 = vmatpush.msrb.mxu3 %v736_v13  ;;  %807 = vmatpush.msra.mxu0 %v766_v37 }
  0x35   : > { %1172 = vmatmul.msk.f32.gmra.mxu3 %vm590_vm0, %v666_v14  ;;  %p1284_p3 = pnand %p1283_p2, %p1279_p13 }
  0x36   : > { %834 = vmatpush.msrb.mxu3 %v735_v15 }
  0x38   : > { %835 = vmatpush.msrb.mxu3 %v734_v16 }
  0x3a   : > { %836 = vmatpush.msrb.mxu3 %v733_v17 }
  0x3c   : > { %837 = vmatpush.msrb.mxu3 %v732_v18 }
  0x3d   : > { %1178 = vmatmul.msk.f32.vlgmr.msrb.gmra.mxu3 %vm729_vm1, %v814_v19 }
  0x45   : > { %1179 = vmatmul.msk.f32.gmra.mxu3 %vm729_vm1, %v815_v20 }
  0xaa   : > { %v611_v21 = vpop.f32.mrf.mxu0 }
  0xab   : > { %v614_v22 = vmax.f32 %v611_v21, 0.0 }
  0xad   : > { %1169 = vmatmul.msk.f32.vlgmr.msra.gmra.mxu2 %vm619_vm2, %v614_v22 }
  0xae   : > { %752 = vmatpush.msra.mxu2 %v739_v10 }
  0xb0   : > { %753 = vmatpush.msra.mxu2 %v738_v11  ;;  %v690_v25 = vpop.f32.mrf.mxu3 }
  0xb1   : > { %v696_v26 = vmax.f32 %v690_v25, 0.0 }
  0xb2   : > { %754 = vmatpush.msra.mxu2 %v737_v12 }
  0xb3   : > { %1173 = vmatmul.msk.f32.vlgmr.msra.gmra.mxu1 %vm619_vm2, %v696_v26 }
  0xb4   : > { %755 = vmatpush.msra.mxu2 %v736_v13 }
  0xb5   : > { %1170 = vmatmul.msk.f32.vlgmr.msrb.gmra.mxu2 %vm619_vm2, %v614_v22 }
  0xb6   : > { %756 = vmatpush.msra.mxu2 %v735_v15 }
  0xb8   : > { %757 = vmatpush.msra.mxu2 %v734_v16  ;;  %v693_v29 = vpop.f32.mrf.mxu3 }
  0xb9   : > { %v697_v30 = vmax.f32 %v693_v29, 0.0 }
  0xba   : > { %758 = vmatpush.msra.mxu2 %v733_v17 }
  0xbb   : > { %1174 = vmatmul.msk.f32.gmra.mxu1 %vm619_vm2, %v697_v30 }
  0xbc   : > { %759 = vmatpush.msra.mxu2 %v732_v18 }
  0xbd   : > { %1175 = vmatmul.msk.f32.vlgmr.msra.gmra.mxu2 %vm729_vm1, %v740_v23 }
  0xc0   : > { %v839_v34 = vpop.f32.mrf.mxu3 }
  0xc1   : > { %v845_v35 = vmax.f32 %v839_v34, 0.0 }
  0xc3   : > { %1180 = vmatmul.msk.f32.vlgmr.msrb.gmra.mxu1 %vm619_vm2, %v845_v35 }
  0xc8   : > { %v842_v38 = vpop.f32.mrf.mxu3 }
  0xc9   : > { %v846_v39 = vmax.f32 %v842_v38, 0.0 }
  0xcb   : > { %1181 = vmatmul.msk.f32.gmra.mxu1 %vm619_vm2, %v846_v39 }
 0x130   : > { %v640_v41 = vpop.f32.mrf.mxu2 }
 0x131   : > { %v641_v42 = vadd.f32 %v640_v41, %v1638_v40 }
 0x133   : > { %663 = vst [vmem:[%s539_s23] sm:$0xff] %v641_v42 }
 0x138   : > { %v660_v44 = vpop.f32.mrf.mxu2 }
 0x139   : > { %v661_v45 = vadd.f32 %v660_v44, %v1642_v43 }
 0x13b   : > { %664 = vst [vmem:[%s539_s23 + $0x8] sm:$0xff] %v661_v45 }
 0x140   : > { %v761_v46 = vpop.f32.mrf.mxu2 }
 0x141   : > { %v764_v47 = vmax.f32 %v761_v46, 0.0 }
 0x143   : > { %1176 = vmatmul.msk.f32.vlgmr.msrb.gmra.mxu0 %vm619_vm2, %v764_v47 }
 0x14b   : > { %1177 = vmatmul.msk.f32.vlgmr.msra.gmra.mxu0 %vm619_vm2, %v764_v47 }
 0x14c   : > { %1287 = shalt.err (!%p1284_p3)
}
 0x14d   : > { %1204 = dma.vmem_to_hbm [thread:$0]  (%p1538_p5), %s910_s16, 256, %s912_s2, %s881_s18   ;;  %v723_v49 = vpop.f32.mrf.mxu1 }
 0x14e   : > { %s1796_s23 = sshll.u32 %s1553_s17, 4  ;;  %s922_s5 = scalar_lea.hbm %s1765_s13, %s1647_s25 }
 0x14f   : > { %s580_s1 = scalar_lea.vmem %s1763_s11, %s1796_s23  ;;  %s546_s6 = scalar_lea.vmem [#allocation4], %s1636_s29 }
 0x150   : > { %v583_v48 = vld [vmem:[%s580_s1] sm:$0xff]  ;;  %s923_s0 = sshll.u32 %s546_s6, 4  ;;  %s885_s30 = sand.u32 1, %s1519_s22   ;;  %v584_v51 = vld [vmem:[%s580_s1 + $0x8] sm:$0xff]  ;;  %s924_s0 = int_to_ptr.vmem [resolvable:$true] %s923_s0 }
 0x151   : > { %v724_v50 = vadd.f32 %v723_v49, %v583_v48  ;;  %s925_s24 = sshll.u32 %s922_s5, 4  ;;  %s1678_s17 = scalar_lea.sflag [#allocation5], %s885_s30  ;;  %s926_s24 = int_to_ptr.hbm [resolvable:$true] %s925_s24 }
 0x152   : > { %s1302_s16 = sshra.s32 %s926_s24, 4  ;;  %s1308_s22 = scalar_lea.hbm %s1765_s13, 32  ;;  %s1303_s16 = int_to_ptr.hbm [resolvable:$true] %s1302_s16 }
 0x153   : > { %730 = vst.msk [vmem:[%s546_s6] sm:$0xff] %vm729_vm1, %v724_v50  ;;  %s1304_s2 = scalar_lea.hbm %s1303_s16, 16  ;;  %p1309_p9 = scmp.lt.s32.totalorder %s1303_s16, %s1765_s13 }
 0x154   : > { %p1305_p4 = scmp.ne.s32.totalorder %s1303_s16, %s1304_s2  ;;  %p1310_p10 = scmp.lt.s32.totalorder %s1308_s22, %s1304_s2 }
 0x155   : > { %v726_v52 = vpop.f32.mrf.mxu1 }
 0x156   : > { %v727_v53 = vadd.f32 %v726_v52, %v584_v51  ;;  %p1306_p7 = pnand %p1305_p4, %p1538_p5  ;;  %p1311_p11 = por %p1310_p10, %p1309_p9 }
 0x158   : > { %731 = vst.msk [vmem:[%s546_s6 + $0x8] sm:$0xff] %vm729_vm1, %v727_v53  ;;  %p1307_p8 = pneg %p1306_p7 }
 0x15a   : > { %p1312_p12 = pnand %p1311_p11, %p1307_p8 }
 0x15c   : > { %1315 = shalt.err (!%p1312_p12)
}
 0x15d   : > { %s1416_s1 = smov 128   ;;  %s1417_s3 = smov 8   ;;  %v872_v54 = vpop.f32.mrf.mxu1 }
 0x15e   : > { %1205 = dma.vmem_to_hbm [thread:$0]  (%p1538_p5), %s924_s0, 256, %s926_s24, %s1678_s17, %s1416_s1, %s1416_s1, %s1417_s3   ;;  %v873_v55 = vadd.f32 %v872_v54, %v583_v48 }
 0x15f   : > { %s560_s4 = scalar_lea.vmem [#allocation7], %s1636_s29  ;;  %s954_s30 = scalar_lea.hbm %s1767_s15, %s1647_s25 }
 0x160   : > { %878 = vst.msk [vmem:[%s560_s4] sm:$0xff] %vm729_vm1, %v873_v55  ;;  %s955_s16 = sshll.u32 %s560_s4, 4  ;;  %s957_s2 = sshll.u32 %s954_s30, 4  ;;  %s956_s16 = int_to_ptr.vmem [resolvable:$true] %s955_s16  ;;  %s958_s2 = int_to_ptr.hbm [resolvable:$true] %s957_s2 }
 0x161   : > { %s896_s18 = scalar_lea.sflag [#allocation8], %s1627_s20  ;;  %s1330_s0 = sshra.s32 %s958_s2, 4  ;;  %s1331_s0 = int_to_ptr.hbm [resolvable:$true] %s1330_s0 }
 0x162   : > { %s1332_s24 = scalar_lea.hbm %s1331_s0, 16  ;;  %s1336_s26 = scalar_lea.hbm %s1767_s15, 32 }
 0x163   : > { %p1333_p13 = scmp.ne.s32.totalorder %s1331_s0, %s1332_s24  ;;  %p1337_p2 = scmp.lt.s32.totalorder %s1331_s0, %s1767_s15 }
 0x164   : > { %p1338_p3 = scmp.lt.s32.totalorder %s1336_s26, %s1332_s24 }
 0x165   : > { %v875_v56 = vpop.f32.mrf.mxu1  ;;  %p1334_p0 = pnand %p1333_p13, %p1538_p5 }
 0x166   : > { %v876_v57 = vadd.f32 %v875_v56, %v584_v51  ;;  %p1339_p4 = por %p1338_p3, %p1337_p2 }
 0x167   : > { %p1335_p1 = pneg %p1334_p0 }
 0x168   : > { %879 = vst.msk [vmem:[%s560_s4 + $0x8] sm:$0xff] %vm729_vm1, %v876_v57 }
 0x169   : > { %p1340_p7 = pnand %p1339_p4, %p1335_p1 }
 0x16b   : > { %1343 = shalt.err (!%p1340_p7)
}
 0x16c   : > { %1207 = dma.vmem_to_hbm [thread:$0]  (%p1538_p5), %s956_s16, 256, %s958_s2, %s896_s18, %s1416_s1, %s1416_s1, %s1417_s3  }
 0x16d   : > { %s553_s20 = scalar_lea.vmem [#allocation6], %s1636_s29  ;;  %s939_s30 = scalar_lea.hbm %s1766_s14, %s1647_s25 }
 0x16e   : > { %s941_s0 = sshll.u32 %s553_s20, 4  ;;  %s943_s24 = sshll.u32 %s939_s30, 4  ;;  %s942_s0 = int_to_ptr.vmem [resolvable:$true] %s941_s0  ;;  %s944_s24 = int_to_ptr.hbm [resolvable:$true] %s943_s24 }
 0x16f   : > { %s1358_s23 = sshra.s32 %s944_s24, 4  ;;  %s1364_s16 = scalar_lea.hbm %s1766_s14, 32  ;;  %s1359_s23 = int_to_ptr.hbm [resolvable:$true] %s1358_s23 }
 0x170   : > { %s1360_s1 = scalar_lea.hbm %s1359_s23, 16  ;;  %p1365_p11 = scmp.lt.s32.totalorder %s1359_s23, %s1766_s14 }
 0x171   : > { %p1361_p8 = scmp.ne.s32.totalorder %s1359_s23, %s1360_s1  ;;  %p1366_p12 = scmp.lt.s32.totalorder %s1364_s16, %s1360_s1 }
 0x173   : > { %p1362_p9 = pnand %p1361_p8, %p1538_p5  ;;  %p1367_p13 = por %p1366_p12, %p1365_p11 }
 0x175   : > { %p1363_p10 = pneg %p1362_p9 }
 0x177   : > { %p1368_p0 = pnand %p1367_p13, %p1363_p10 }
 0x1c0   : > { %v789_v58 = vpop.f32.mrf.mxu0 }
 0x1c1   : > { %v790_v59 = vadd.f32 %v789_v58, %v1638_v40 }
 0x1c3   : > { %812 = vst [vmem:[%s553_s20] sm:$0xff] %v790_v59 }
 0x1c8   : > { %v809_v60 = vpop.f32.mrf.mxu0 }
 0x1c9   : > { %v810_v61 = vadd.f32 %v809_v60, %v1642_v43 }
 0x1cb   : > { %813 = vst [vmem:[%s553_s20 + $0x8] sm:$0xff] %v810_v61 }
 0x1cc   : > { %1371 = shalt.err (!%p1368_p0)
}
 0x1cd   : > { %1206 = dma.vmem_to_hbm [thread:$0]  (%p1538_p5), %s942_s0, 256, %s944_s24, %s1678_s17  }
 0x1ce PF: > { %s1797_s18 = sld [smem:[#allocation12_spill]]  ;;  %p1225_p1 = scmp.ge.s32.totalorder %s1414_s21, 2 }
 0x1d0   : > { %p1213_p2 = pnand %p1225_p1, %p1542_p6 }
 0x1d2   : > { %p1214_p3 = pneg %p1213_p2 }
 0x1d4   : > { %s972_s26 = sand.u32 1, %s1797_s18  }
 0x1d5   : > { %s973_s27 = scalar_lea.sflag [#allocation3], %s972_s26 }
 0x1d6   : > { %1389 = dma.done.wait (%p1214_p3), %s973_s27, 256  }
 0x1d7   : > { %1391 = vsyncadd (%p1214_p3), %s973_s27, 4294967040  ;;  %s1799_s5 = sadd.s32 4294967294, %s1414_s21  }
 0x1d8   : > { %s982_s20 = sand.u32 1, %s1799_s5  }
 0x1d9   : > { %s983_s4 = scalar_lea.sflag [#allocation5], %s982_s20 }
 0x1da   : > { %1393 = dma.done.wait (%p1214_p3), %s983_s4, 512  }
 0x1db   : > { %1395 = vsyncadd (%p1214_p3), %s983_s4, 4294966784  ;;  %s1003_s28 = scalar_lea.sflag [#allocation8], %s972_s26 }
 0x1dc   : > { %1397 = dma.done.wait (%p1214_p3), %s1003_s28, 256  }
 0x1dd   : > { %1399 = vsyncadd (%p1214_p3), %s1003_s28, 4294967040  ;;  %s1800_s21 = sld [smem:[#allocation14_spill]]  ;;  %s1803_s18 = smov %s1406_s19 }
 0x1de   : > { %s1801_s17 = sld [smem:[#allocation13_spill]] }
 0x1df   : > { %s1802_s20 = sld [smem:[#allocation15_spill]] }
 0x1e3   : > { %p32_p5 = scmp.ge.s32.totalorder %s1800_s21, 4  }
 0x1e4   : > { %s1804_s19 = smov %s1801_s17 }
 0x1e5   :  { %34 = sbr.rel (!%p32_p5) target bundleno = 15 (0xf), region = 161 }
 0x1ea   :  { %1009 = vsyncpa [#allocation3], 1 }
 0x1eb   :  { %1011 = vsyncpa [#allocation3 + $0x1], 1 }
 0x1ec   :  { %1012 = vsyncpa [#allocation5], 1 }
 0x1ed   :  { %1014 = vsyncpa [#allocation5 + $0x1], 1 }
 0x1ee   :  { %1015 = vsyncpa [#allocation8], 1 }
 0x1ef   :  { %1017 = vsyncpa [#allocation8 + $0x1], 1 }

</bundles_post_ra>
